<compile_context>
chip_gen: v7x
topology: tpu7x:2x2x1
jax: 0.10.0
libtpu: 0.0.40
codegen_flags: <defaults>
</compile_context>

<pallas_src>
import math
import functools

import jax
import jax.numpy as jnp
from jax import lax
from jax.experimental import pallas as pl
from jax.experimental.pallas import tpu as pltpu


# ------------------------------ Pallas kernel -----------------------------
def _selfattn_kernel(normalize_output,
                     x_ref, m_ref, w1_ref, aux_ref,
                     out_ref, wts_ref):
    """One batch-block of the SelfAttn forward.

    x_ref   : (bb, S, D)  input features for this batch block
    m_ref   : (bb, S, 1)  mask[:, -1] (broadcast over D inside)
    w1_ref  : (D, D)      Linear(d_model, d_model) weight, pre-transposed (in, out)
    aux_ref : (2, D)      row 0 = Linear1 bias, row 1 = Linear(d_model, 1) weight
    out_ref : (bb, 1, D)  attended output (squeezed in the wrapper)
    wts_ref : (bb, 1, S)  attention weights, lane-dense (squeezed in wrapper)
    """
    x = x_ref[...]                                    # (bb, S, D)
    m = m_ref[...]                                    # (bb, S, 1)
    xm = x * m                                        # mask broadcast over lanes (D)

    bb, S, D = xm.shape
    aux = aux_ref[...]                                # (2, D)
    b1 = aux[0:1, :]                                  # (1, D)
    w2 = aux[1:2, :]                                  # (1, D)

    # Linear(d_model, d_model): one MXU matmul with M = bb*S (batch folded
    # into M, no weight replication).  Leading-dim collapse reshape is free.
    xm_flat = xm.reshape(bb * S, D)
    h = jnp.tanh(
        jnp.dot(xm_flat, w1_ref[...], preferred_element_type=jnp.float32) + b1)
    # TODO(synk): nn.Dropout(0.1) inside s1 is stochastic in train mode; here it
    # is the inference-mode identity.
    s1 = (xm_flat * h).reshape(bb, S, D)              # x.mul(s1_out)

    # Linear(d_model, 1) as a contraction over D producing lane-dense logits
    # (bb, 1, S).  The scalar bias b2 is omitted: softmax over dim=1 is
    # invariant to a constant shift, so it cannot affect weights or output.
    w2b = jnp.broadcast_to(w2.reshape(1, 1, D), (bb, 1, D))
    logits = jnp.einsum('bod,bsd->bos', w2b, s1,
                        preferred_element_type=jnp.float32)      # (bb, 1, S)

    # Numerically stable softmax over the sequence axis (lanes).
    mx = jnp.max(logits, axis=-1, keepdims=True)                 # (bb, 1, 1)
    e = jnp.exp(logits - mx)                                     # (bb, 1, S)
    denom = jnp.sum(e, axis=-1, keepdims=True)                   # (bb, 1, 1)
    weights = e * pl.reciprocal(denom, approx=True)              # (bb, 1, S)

    # Weighted sum over the sequence of the *masked* input via the MXU.
    out = jnp.einsum('bls,bsd->bld', weights, xm,
                     preferred_element_type=jnp.float32)         # (bb, 1, D)

    if normalize_output:
        # F.normalize: out / max(||out||_2, 1e-12)  ==  out * rsqrt(max(ss, 1e-24))
        sumsq = jnp.sum(out * out, axis=-1, keepdims=True)
        out = out * lax.rsqrt(jnp.maximum(sumsq, 1e-24))

    out_ref[...] = out.astype(out_ref.dtype)
    wts_ref[...] = weights.astype(wts_ref.dtype)


def selfattn_forward(x, mask, params, *, normalize_output=False,
                     return_weights=False, block_b=1):
    """SelfAttn.forward as one pallas_call with a parallel grid over batch.

    block_b: batch rows per grid step.  Keep >=2 grid steps on v7x so both
    TensorCores get work; for production sizes pick block_b so the per-step
    footprint (xm/h/s1 + double-buffered inputs) stays well under the scoped
    VMEM limit (32 MiB default on v6e/v7x).
    """
    B, S, D = x.shape
    # torch: mask = stack(D * [mask[:, -1]], dim=2); keep it (B, S, 1) and let
    # the kernel broadcast over the lane (feature) dim.
    mask_last = mask[:, -1, :][:, :, None].astype(x.dtype)             # (B, S, 1)
    # Pack the two small per-channel vectors into one lane-dense (2, D) tile.
    aux = jnp.stack([params["b1"], params["w2"]], axis=0)              # (2, D)

    block_b = max(1, min(block_b, B))
    while B % block_b:           # keep blocks exact (avoid partial-block rows)
        block_b -= 1
    grid = (B // block_b,)

    kernel = functools.partial(_selfattn_kernel, normalize_output)
    out3, w3 = pl.pallas_call(
        kernel,
        out_shape=(jax.ShapeDtypeStruct((B, 1, D), x.dtype),
                   jax.ShapeDtypeStruct((B, 1, S), x.dtype)),
        grid=grid,
        in_specs=[
            pl.BlockSpec((block_b, S, D), lambda i: (i, 0, 0)),
            pl.BlockSpec((block_b, S, 1), lambda i: (i, 0, 0)),
            pl.BlockSpec((D, D), lambda i: (0, 0)),   # constant block -> DMA'd once
            pl.BlockSpec((2, D), lambda i: (0, 0)),   # constant block -> DMA'd once
        ],
        out_specs=(
            pl.BlockSpec((block_b, 1, D), lambda i: (i, 0, 0)),
            pl.BlockSpec((block_b, 1, S), lambda i: (i, 0, 0)),
        ),
        compiler_params=pltpu.CompilerParams(
            dimension_semantics=("parallel",)),
    )(x, mask_last, params["w1"], aux)

    out = out3[:, 0, :]                                                # (B, D)
    weights = w3[:, 0, :]                                              # (B, S)
    if return_weights:
        return out, weights
    return out


# -------------------------- deterministic params ---------------------------
def init_params(key, d_model):
    k1, k2, k3, k4 = jax.random.split(key, 4)
    bound = 1.0 / math.sqrt(d_model)
    # Linear weights stored pre-transposed as (in, out) so the kernel does x @ w.
    w1 = jax.random.uniform(k1, (d_model, d_model), jnp.float32, -bound, bound)
    b1 = jax.random.uniform(k2, (d_model,), jnp.float32, -bound, bound)
    w2 = jax.random.uniform(k3, (d_model,), jnp.float32, -bound, bound)  # Linear(d,1)
    b2 = jax.random.uniform(k4, (), jnp.float32, -bound, bound)          # (dead under softmax)
    return dict(w1=w1, b1=b1, w2=w2, b2=b2)


# ------------------------------ pure-JAX ref --------------------------------
def selfattn_reference(x, mask, params, normalize_output=False):
    m = mask[:, -1, :]                                   # (B, S)
    xm = x * m[:, :, None]
    h = jnp.tanh(xm @ params["w1"] + params["b1"])       # Dropout = identity (eval)
    s1 = xm * h
    logits = jnp.einsum('bsd,d->bs', s1, params["w2"]) + params["b2"]
    w = jax.nn.softmax(logits, axis=1)
    out = jnp.einsum('bs,bsd->bd', w, xm)
    if normalize_output:
        nrm = jnp.sqrt(jnp.sum(out * out, axis=-1, keepdims=True))
        out = out / jnp.maximum(nrm, 1e-12)
    return out, w


if __name__ == "__main__":
    key = jax.random.PRNGKey(0)
    kx, km, kp = jax.random.split(key, 3)

    B, S, D = 2, 8, 32                                  # batch, seq, d_model
    x = jax.random.normal(kx, (B, S, D), jnp.float32)
    # mask of shape (B, T, S); only mask[:, -1] is used by the module.
    mask = (jax.random.uniform(km, (B, S, S)) > 0.25).astype(jnp.float32)
    params = init_params(kp, D)

    out, w = selfattn_forward(x, mask, params, return_weights=True)
    out = jax.block_until_ready(out)

    ref_out, ref_w = selfattn_reference(x, mask, params)
    assert out.shape == (B, D) and w.shape == (B, S)
    # Tolerance loosened from 1e-4 -> 2e-3 because the softmax uses the EUP
    # approximate reciprocal (pl.reciprocal(approx=True)).
    assert jnp.max(jnp.abs(out - ref_out)) < 2e-3, "output mismatch vs JAX reference"
    assert jnp.max(jnp.abs(w - ref_w)) < 2e-3, "weights mismatch vs JAX reference"

    # Also exercise the normalize_output=True path.
    out_n = selfattn_forward(x, mask, params, normalize_output=True)
    out_n = jax.block_until_ready(out_n)
    ref_n, _ = selfattn_reference(x, mask, params, normalize_output=True)
    assert jnp.max(jnp.abs(out_n - ref_n)) < 2e-3, "normalized output mismatch"

    print("KERNEL_OK")
</pallas_src>

<mosaic_0001>
module attributes {stable_mosaic.version = 11 : i64} {
  func.func @_selfattn_kernel(%arg0: i32, %arg1: memref<1x8x32xf32, #tpu.memory_space<vmem>>, %arg2: memref<1x8x1xf32, #tpu.memory_space<vmem>>, %arg3: memref<32x32xf32, #tpu.memory_space<vmem>>, %arg4: memref<2x32xf32, #tpu.memory_space<vmem>>, %arg5: memref<1x1x32xf32, #tpu.memory_space<vmem>>, %arg6: memref<1x1x8xf32, #tpu.memory_space<vmem>>) attributes {dimension_semantics = [#tpu.dimension_semantics<parallel>], iteration_bounds = array<i64: 2>, scalar_prefetch = 0 : i64, scratch_operands = 0 : i64, tpu.core_type = #tpu.core_type<tc>, window_params = [{transform_indices = @transform_0, window_bounds = array<i64: 1, 8, 32>}, {transform_indices = @transform_1, window_bounds = array<i64: 1, 8, 1>}, {pipeline_mode = #tpu.pipeline_mode<synchronous>, transform_indices = @transform_2, window_bounds = array<i64: 32, 32>}, {pipeline_mode = #tpu.pipeline_mode<synchronous>, transform_indices = @transform_3, window_bounds = array<i64: 2, 32>}, {transform_indices = @transform_4, window_bounds = array<i64: 1, 1, 32>}, {transform_indices = @transform_5, window_bounds = array<i64: 1, 1, 8>}]} {
    %c0 = arith.constant 0 : index
    %c0_0 = arith.constant 0 : index
    %c0_1 = arith.constant 0 : index
    %0 = vector.load %arg1[%c0, %c0_0, %c0_1] : memref<1x8x32xf32, #tpu.memory_space<vmem>>, vector<1x8x32xf32>
    %c0_2 = arith.constant 0 : index
    %c0_3 = arith.constant 0 : index
    %c0_4 = arith.constant 0 : index
    %1 = vector.load %arg2[%c0_2, %c0_3, %c0_4] : memref<1x8x1xf32, #tpu.memory_space<vmem>>, vector<1x8x1xf32>
    %2 = vector.broadcast %1 : vector<1x8x1xf32> to vector<1x8x32xf32>
    %3 = arith.mulf %0, %2 : vector<1x8x32xf32>
    %c0_5 = arith.constant 0 : index
    %c0_6 = arith.constant 0 : index
    %4 = vector.load %arg4[%c0_5, %c0_6] : memref<2x32xf32, #tpu.memory_space<vmem>>, vector<2x32xf32>
    %5 = vector.extract_strided_slice %4 {offsets = [0, 0], sizes = [1, 32], strides = [1, 1]} : vector<2x32xf32> to vector<1x32xf32>
    %6 = vector.extract_strided_slice %4 {offsets = [1, 0], sizes = [1, 32], strides = [1, 1]} : vector<2x32xf32> to vector<1x32xf32>
    %7 = vector.shape_cast %3 : vector<1x8x32xf32> to vector<8x32xf32>
    %c0_7 = arith.constant 0 : index
    %c0_8 = arith.constant 0 : index
    %8 = vector.load %arg3[%c0_7, %c0_8] : memref<32x32xf32, #tpu.memory_space<vmem>>, vector<32x32xf32>
    %cst = arith.constant dense<0.000000e+00> : vector<8x32xf32>
    %9 = tpu.matmul %7, %8, %cst {dimension_numbers = #tpu.dot_dimension_numbers<[1], [0], [0], [1], [0, 0, 1, 1], [], []>} : vector<8x32xf32>, vector<32x32xf32>, vector<8x32xf32> -> vector<8x32xf32>
    %10 = vector.broadcast %5 : vector<1x32xf32> to vector<8x32xf32>
    %11 = arith.addf %9, %10 : vector<8x32xf32>
    %12 = math.tanh %11 : vector<8x32xf32>
    %13 = arith.mulf %7, %12 : vector<8x32xf32>
    %14 = vector.shape_cast %13 : vector<8x32xf32> to vector<1x8x32xf32>
    %15 = vector.shape_cast %6 : vector<1x32xf32> to vector<1x1x32xf32>
    "tpu.trace_start"() <{level = 10 : i32, message = "bod,bsd->bos"}> : () -> ()
    %cst_9 = arith.constant dense<0.000000e+00> : vector<1x1x8xf32>
    %16 = tpu.matmul %15, %14, %cst_9 {dimension_numbers = #tpu.dot_dimension_numbers<[2], [2], [1], [1], [0, 0, 0, 1, 1, 1], [0], [0]>} : vector<1x1x32xf32>, vector<1x8x32xf32>, vector<1x1x8xf32> -> vector<1x1x8xf32>
    "tpu.trace_stop"() : () -> ()
    %cst_10 = arith.constant dense<0xFF800000> : vector<1x1xf32>
    %17 = vector.multi_reduction <maximumf>, %16, %cst_10 [2] : vector<1x1x8xf32> to vector<1x1xf32>
    %18 = vector.shape_cast %17 : vector<1x1xf32> to vector<1x1x1xf32>
    %19 = vector.broadcast %18 : vector<1x1x1xf32> to vector<1x1x8xf32>
    %20 = arith.subf %16, %19 : vector<1x1x8xf32>
    %21 = math.exp %20 : vector<1x1x8xf32>
    %cst_11 = arith.constant dense<0.000000e+00> : vector<1x1xf32>
    %22 = vector.multi_reduction <add>, %21, %cst_11 [2] : vector<1x1x8xf32> to vector<1x1xf32>
    %23 = vector.shape_cast %22 : vector<1x1xf32> to vector<1x1x1xf32>
    %24 = tpu.reciprocal %23 {approx = true} : vector<1x1x1xf32> -> vector<1x1x1xf32>
    %25 = vector.broadcast %24 : vector<1x1x1xf32> to vector<1x1x8xf32>
    %26 = arith.mulf %21, %25 : vector<1x1x8xf32>
    "tpu.trace_start"() <{level = 10 : i32, message = "bls,bsd->bld"}> : () -> ()
    %cst_12 = arith.constant dense<0.000000e+00> : vector<1x1x32xf32>
    %27 = tpu.matmul %26, %3, %cst_12 {dimension_numbers = #tpu.dot_dimension_numbers<[2], [1], [1], [2], [0, 0, 0, 1, 1, 2], [0], [0]>} : vector<1x1x8xf32>, vector<1x8x32xf32>, vector<1x1x32xf32> -> vector<1x1x32xf32>
    "tpu.trace_stop"() : () -> ()
    %c0_13 = arith.constant 0 : index
    %c0_14 = arith.constant 0 : index
    %c0_15 = arith.constant 0 : index
    %28 = vector.load %arg5[%c0_13, %c0_14, %c0_15] : memref<1x1x32xf32, #tpu.memory_space<vmem>>, vector<1x1x32xf32>
    tpu.vector_store %arg5[%c0_13, %c0_14, %c0_15], %27 {strides = array<i32>} : memref<1x1x32xf32, #tpu.memory_space<vmem>>, vector<1x1x32xf32>,
    %c0_16 = arith.constant 0 : index
    %c0_17 = arith.constant 0 : index
    %c0_18 = arith.constant 0 : index
    %29 = vector.load %arg6[%c0_16, %c0_17, %c0_18] : memref<1x1x8xf32, #tpu.memory_space<vmem>>, vector<1x1x8xf32>
    tpu.vector_store %arg6[%c0_16, %c0_17, %c0_18], %26 {strides = array<i32>} : memref<1x1x8xf32, #tpu.memory_space<vmem>>, vector<1x1x8xf32>,
    return
  }
  func.func @transform_0(%arg0: i32) -> (i32, i32, i32) {
    %c0_i32 = arith.constant 0 : i32
    %c0_i32_0 = arith.constant 0 : i32
    %c0_i32_1 = arith.constant 0 : i32
    return %arg0, %c0_i32, %c0_i32_0 : i32, i32, i32
  }
  func.func @transform_1(%arg0: i32) -> (i32, i32, i32) {
    %c0_i32 = arith.constant 0 : i32
    %c0_i32_0 = arith.constant 0 : i32
    %c0_i32_1 = arith.constant 0 : i32
    return %arg0, %c0_i32, %c0_i32_0 : i32, i32, i32
  }
  func.func @transform_2(%arg0: i32) -> (i32, i32) {
    %c0_i32 = arith.constant 0 : i32
    %c0_i32_0 = arith.constant 0 : i32
    %c0_i32_1 = arith.constant 0 : i32
    return %c0_i32, %c0_i32_0 : i32, i32
  }
  func.func @transform_3(%arg0: i32) -> (i32, i32) {
    %c0_i32 = arith.constant 0 : i32
    %c0_i32_0 = arith.constant 0 : i32
    %c0_i32_1 = arith.constant 0 : i32
    return %c0_i32, %c0_i32_0 : i32, i32
  }
  func.func @transform_4(%arg0: i32) -> (i32, i32, i32) {
    %c0_i32 = arith.constant 0 : i32
    %c0_i32_0 = arith.constant 0 : i32
    %c0_i32_1 = arith.constant 0 : i32
    return %arg0, %c0_i32, %c0_i32_0 : i32, i32, i32
  }
  func.func @transform_5(%arg0: i32) -> (i32, i32, i32) {
    %c0_i32 = arith.constant 0 : i32
    %c0_i32_0 = arith.constant 0 : i32
    %c0_i32_1 = arith.constant 0 : i32
    return %arg0, %c0_i32, %c0_i32_0 : i32, i32, i32
  }
}

</mosaic_0001>

<bundles_post_ra>
// kernel: tpu_custom_call.1
= control target key start
LH: loop header
LB: loop body
LE: loop exit
PB: predicated region body
PF: predicated region fallthrough
CT: control target
= control target key end

     0   :  { %11 = vsyncpa [#allocation3], 0  ;;  %s1126_s0 = inlined_call_operand.vmem [shape: f32[2,8,32], index: 0, kind: input, shape index: {}]   ;;  %s1127_s1 = inlined_call_operand.vmem [shape: f32[2,8,1], index: 1, kind: input, shape index: {}]   ;;  %s1128_s2 = inlined_call_operand.hbm [shape: f32[32,32], index: 2, kind: input, shape index: {}]   ;;  %s1129_s3 = inlined_call_operand.vmem [shape: f32[2,32], index: 3, kind: input, shape index: {}]   ;;  %s1130_s4 = inlined_call_operand.hbm [shape: f32[2,1,32], index: 4, kind: output, shape index: {0}]   ;;  %s1131_s5 = inlined_call_operand.hbm [shape: f32[2,1,8], index: 5, kind: output, shape index: {1}]  }
   0x1   :  { %12 = vsyncpa [#allocation4], 0 }
   0x2   :  { %14 = vsyncpa [#allocation4 + $0x1], 0 }
   0x3   :  { %15 = vsyncpa [#allocation7], 0 }
   0x4   :  { %17 = vsyncpa [#allocation7 + $0x1], 0  ;;  %s944_s18 = smov 0   ;;  %s946_s19 = smov 0  }
   0x5   :  { %s948_s20 = smov 0   ;;  %s950_s21 = smov 0  }
   0x6 LB: > { %s965_s22 = sadd.s32 4294967295, %s903_s21   ;;  %s657_s23 = sadd.s32 4294967294, %s903_s21   ;;  %s903_s21 = sphi %s950_s21, %s1147_s21   ;;  %s899_s20 = sphi %s948_s20, %s1146_s20   ;;  %s895_s19 = sphi %s946_s19, %s1145_s19   ;;  %s891_s18 = sphi %s944_s18, %s1144_s18  }
   0x7   : > { %s969_s24 = sadd.s32 1, %s903_s21   ;;  %s124_s25 = sadd.s32 1, %s899_s20 }
   0x8   : > { %s121_s26 = ssub.s32 %s903_s21, %s969_s24  ;;  %p134_p0 = scmp.ne.s32.totalorder %s899_s20, %s895_s19 }
   0x9   : > { %p122_p1 = scmp.eq.s32.totalorder %s121_s26, 0  ;;  %p135_p2 = scmp.eq.s32.totalorder %s965_s22, 1 }
   0xa   : > { %p140_p3 = scmp.ne.s32.totalorder %s895_s19, %s891_s18  ;;  %p141_p4 = scmp.eq.s32.totalorder %s657_s23, 1 }
   0xb   : > { %s980_s27 = scalar_select %p122_p1, %s899_s20, %s124_s25  }
   0xc   : > { %p982_p5 = por %p135_p2, %p134_p0  ;;  %p986_p6 = por %p141_p4, %p140_p3 }
   0xd   : > { %p658_p7 = scmp.ge.s32.totalorder %s903_s21, 1  ;;  %p174_p8 = scmp.lt.s32.totalorder %s903_s21, 3 }
   0xe   : > { %s1135_s28 = scalar_select %p982_p5, 1, 0 }
   0xf   : > { %s1136_s29 = scalar_select %p986_p6, 1, 0 }
  0x10   : > { %p1132_p9 = scmp.eq.s32.totalorder %s965_s22, 0  ;;  %p993_p10 = pnand %p658_p7, %p174_p8 }
  0x11   : > { %s905_s6 = smov [#allocation2]   ;;  %s777_s11 = scalar_lea.hbm %s1128_s2, 512 }
  0x12   : > { %s1137_s30 = scalar_select %p993_p10, 1, 0 }
  0x13   : > { %s186_s7 = sshll.u32 %s905_s6, 4  ;;  %p717_p11 = pneg %p993_p10  ;;  %s187_s7 = int_to_ptr.vmem [resolvable:$true] %s186_s7 }
  0x14   : > { %p778_p13 = scmp.ne.s32.totalorder %s1128_s2, %s777_s11  ;;  %p784_p3 = scmp.lt.u32.totalorder %s777_s11, %s1128_s2 }
  0x15   : > { %p1001_p12 = pnand %p1132_p9, %p717_p11 }
  0x17   : > { %p779_p0 = pneg %p1001_p12 }
  0x19   : > { %p780_p1 = pnand %p779_p0, %p778_p13 }
  0x1b   : > { %p781_p2 = pneg %p780_p1 }
  0x1d   : > { %p786_p4 = pnand %p784_p3, %p781_p2 }
  0x1f   : > { %789 = shalt.err (!%p786_p4)
}
  0x20   : > { %s790_s16 = scalar_lea.vmem %s187_s7, 512  ;;  %p798_p9 = scmp.lt.s32.totalorder %s187_s7, %s187_s7 }
  0x21   : > { %p791_p7 = scmp.ne.s32.totalorder %s187_s7, %s790_s16  ;;  %p799_p6 = scmp.lt.s32.totalorder %s790_s16, %s790_s16 }
  0x23   : > { %p793_p8 = pnand %p791_p7, %p779_p0  ;;  %p800_p5 = por %p799_p6, %p798_p9 }
  0x25   : > { %p794_p11 = pneg %p793_p8 }
  0x27   : > { %p801_p10 = pnand %p800_p5, %p794_p11 }
  0x29   : > { %804 = shalt.err (!%p801_p10)
}
  0x2a   : > { %s906_s17 = smov 128   ;;  %s907_s23 = smov 8  }
  0x2b   : > { %720 = dma.hbm_to_vmem [thread:$0]  (!%p1001_p12), %s1128_s2, 512, %s187_s7, [#allocation3], %s906_s17, %s906_s17, %s907_s23  }
  0x2c   : > { %p1139_p13 = scmp.ne.s32.totalorder %s1137_s30, 0 }
  0x2d   : > { %p1140_p1 = scmp.eq.s32.totalorder (!%p1139_p13), %s965_s22, 0 }
  0x2e   : > { %219 = sbr.rel (%p1139_p13) target bundleno = 1173 (0x495), region = 36 }
  0x35   : > { %878 = dma.done.wait (%p1140_p1), [#allocation3], 512   ;;  %p1141_p0 = pmov %p1140_p1 }
  0x36   : > { %p253_p5 = scmp.lt.s32.totalorder %s965_s22, 1  ;;  %v908_v0 = vmov 0   ;;  %v909_v1 = vmov 0.0|0.0   ;;  %v270_v3 = vld [vmem:[#allocation2] sm:$0xff]  ;;  %v271_v4 = vld [vmem:[#allocation2 + $0x8] sm:$0xff]  ;;  %v272_v6 = vld [vmem:[#allocation2 + $0x10] sm:$0xff]  ;;  %v274_v13 = vlaneseq }
  0x37   : > { %880 = vsyncadd (%p1141_p0), [#allocation3], 4294966784  ;;  %770 = vset.pattern.permute.xlu0 %v908_v0  ;;  %703 = vmatprep.subr.bf16.mxu0 %v909_v1  ;;  %v704_v5 = vpack.c.bf16 %v271_v4, %v270_v3  ;;  %v273_v7 = vld [vmem:[#allocation2 + $0x18] sm:$0xff]  ;;  %vm910_vm0 = vmmov 0   ;;  %v911_v8 = vmov 0.0   ;;  %vm278_vm1 = vcmask 261120  }
  0x38   : > { %s254_s6 = scalar_select %p253_p5, %s965_s22, 1  ;;  %690 = vmatprep.mubr.msk.f32.mxu0 %vm910_vm0, %v911_v8  ;;  %693 = vmatprep.subr.mxu1 %v911_v8  ;;  %v707_v9 = vpack.c.bf16 %v273_v7, %v272_v6  ;;  %v275_v14 = vshrl.u32 %v274_v13, 7  ;;  %v269_v16 = vld [vmem:[%s1129_s3] sm:$0x3]  ;;  %vm431_vm2 = vcmask 57344   ;;  %vm443_vm3 = vcmask 64512  }
  0x39   : > { %705 = vmatpush3.bf16.msra.mxu0 %v704_v5  ;;  %695 = vmatprep.mubr.msk.f32.mxu1 %vm910_vm0, %v911_v8  ;;  %v355_v23 = vrot.slane %v269_v16, 1  ;;  %s1047_s15 = sand.u32 1, %s895_s19   ;;  %s669_s17 = sshll.u32 %s965_s22, 4 }
  0x3a   : > { %s663_s8 = sshll.u32 %s254_s6, 3  ;;  %706 = vmatprep.subr.bf16.mxu0 %v909_v1  ;;  %v276_v15 = vsub.s32 0, %v275_v14  ;;  %s252_s16 = scalar_lea.vmem [#allocation6], %s1047_s15 }
  0x3b   : > { %s260_s30 = scalar_lea.vmem %s1127_s1, %s663_s8  ;;  %s256_s12 = scalar_lea.vmem %s1126_s0, %s663_s8 }
  0x3c   : > { %v262_v2 = vld [vmem:[%s260_s30] sm:$0xff]  ;;  %v277_v17 = vrot.slane %v269_v16, %v276_v15  ;;  %s1057_s26 = scalar_lea.hbm %s1131_s5, %s669_s17  ;;  %s550_s6 = sshll.u32 %s252_s16, 4  ;;  %s551_s6 = int_to_ptr.vmem [resolvable:$true] %s550_s6 }
  0x3d   : > { %265 = vperm.xlu0 %770, %v262_v2   ;;  %708 = vmatpush3.bf16.msra.mxu0 %v707_v9  ;;  %v261_v10 = vld [vmem:[%s256_s12] sm:$0xff]  ;;  %s525_s8 = scalar_lea.sflag [#allocation7], %s1047_s15  ;;  %s805_s9 = scalar_lea.vmem %s551_s6, 16 }
  0x3e   : > { %p806_p6 = scmp.ne.s32.totalorder %s551_s6, %s805_s9  ;;  %p1142_p9 = scmp.ne.s32.totalorder %s1135_s28, 0 }
  0x3f   : > { %s912_s7 = smov [#allocation6]  }
  0x40   : > { %p807_p10 = pnand %p806_p6, %p1142_p9  ;;  %s809_s30 = sshll.u32 %s912_s7, 4  ;;  %s810_s30 = int_to_ptr.vmem [resolvable:$false] %s809_s30 }
  0x41   : > { %s811_s10 = scalar_lea.vmem %s810_s30, 32  ;;  %p812_p2 = scmp.lt.s32.totalorder %s551_s6, %s810_s30 }
  0x42   : > { %p808_p12 = pneg %p807_p10  ;;  %p813_p3 = scmp.lt.s32.totalorder %s811_s10, %s805_s9 }
  0x44   : > { %p814_p4 = por %p813_p3, %p812_p2 }
  0x46   : > { %p815_p7 = pnand %p814_p4, %p808_p12 }
  0xbc   : > { %v266_v11 = vpop.permute.xlu0 %265 }
  0xbd   : > { %v268_v12 = vmul.f32 %v266_v11, %v261_v10 }
  0xbf   : > { %691 = vmatmul.mubr.msk.f32.vlgmr.msra.gmra.mrb[0].mxu0 %vm278_vm1, %v268_v12 }
 0x192   : > { %v348_v18 = vpop.f32.mrb[0].mxu0 }
 0x193   : > { %v349_v19 = vadd.f32 %v348_v18, %v277_v17  ;;  %v692_v20 = vpop.f32.mrb[1].mxu0 }
 0x195   : > { %771 = vtanh.f32 %v349_v19 }
 0x19f   : > { %v772_v21 = vpop.eup %771 }
 0x1a0   : > { %v353_v22 = vmul.f32 %v772_v21, %v268_v12 }
 0x1a2   : > { %694 = vmatpush3.xpose.msk.msra.mxu1 %vm278_vm1, %v353_v22 }
 0x1a3   : > { %698 = vmatprep.subr.mxu1 %v911_v8 }
 0x1a5   : > { %696 = vmatmul.mubr.msk.f32.vlgmr.msra.gmra.mrb[0].mxu1 %vm278_vm1, %v355_v23 }
 0x1a6   : > { %699 = vmatpush3.msra.mxu1 %v268_v12  ;;  %700 = vmatprep.mubr.msk.f32.mxu1 %vm910_vm0, %v911_v8 }
 0x278   : > { %v427_v24 = vpop.f32.mrb[0].mxu1 }
 0x279   : > { %v697_v25 = vpop.f32.mrb[1].mxu1  ;;  %v432_v26 = vsel %vm431_vm2, %v427_v24, -inf }
 0x27a   : > { %433 = vmax.xlane.f32.xlu0 %v432_v26 }
 0x307   : > { %v434_v27 = vpop.xlane.xlu0 %433 }
 0x308   : > { %v435_v28 = vsub.f32 %v427_v24, %v434_v27 }
 0x30a   : > { %v436_v29 = vmul.f32 1.442695, %v435_v28 }
 0x30c   : > { %773 = vpow2.f32 %v436_v29 }
 0x316   : > { %v774_v30 = vpop.eup %773 }
 0x317   : > { %v438_v31 = vsel %vm431_vm2, %v774_v30, 0.0 }
 0x318   : > { %439 = vadd.xlane.f32.xlu1 %v438_v31 }
 0x3a5   : > { %v440_v32 = vpop.xlane.xlu1 %439 }
 0x3a6   : > { %775 = vrcp.f32 %v440_v32 }
 0x3b0   : > { %v776_v33 = vpop.eup %775 }
 0x3b1   : > { %v442_v34 = vmul.f32 %v776_v33, %v774_v30 }
 0x3b3   : > { %701 = vmatmul.mubr.msk.f32.vlgmr.msra.gmra.mrb[2].mxu1 %vm443_vm3, %v442_v34  ;;  %519 = vst.msk [vmem:[%s252_s16] sm:$0x1] %vm431_vm2, %v442_v34 }
 0x3b4   : > { %818 = shalt.err (!%p815_p7)
}
 0x3b5   : > { %s819_s11 = scalar_lea.hbm %s1057_s26, 16  ;;  %s823_s14 = scalar_lea.hbm %s1131_s5, 32 }
 0x3b6   : > { %p820_p8 = scmp.ne.s32.totalorder %s1057_s26, %s819_s11  ;;  %p824_p1 = scmp.lt.u32.totalorder %s1057_s26, %s1131_s5 }
 0x3b7   : > { %p825_p0 = scmp.lt.u32.totalorder %s823_s14, %s819_s11  ;;  %p827_p6 = scmp.lt.u32.totalorder %s819_s11, %s1057_s26 }
 0x3b8   : > { %p821_p11 = pnand %p820_p8, %p1142_p9 }
 0x3b9   : > { %p826_p5 = por %p825_p0, %p824_p1 }
 0x3ba   : > { %p822_p13 = pneg %p821_p11 }
 0x3bb   : > { %p828_p10 = por %p827_p6, %p826_p5 }
 0x3bd   : > { %p829_p12 = pnand %p828_p10, %p822_p13 }
 0x3bf   : > { %832 = shalt.err (!%p829_p12)
}
 0x3c0   : > { %714 = dma.vmem_to_hbm [thread:$0]  (%p1142_p9), %s551_s6, 16, %s1057_s26, %s525_s8   ;;  %vm517_vm4 = vcmask 253952  }
 0x3c1   : > { %s246_s25 = scalar_lea.vmem [#allocation5], %s1047_s15  ;;  %s1083_s10 = scalar_lea.hbm %s1130_s4, %s669_s17 }
 0x3c2   : > { %s537_s9 = sshll.u32 %s246_s25, 4  ;;  %s521_s11 = scalar_lea.sflag [#allocation4], %s1047_s15  ;;  %s1085_s9 = int_to_ptr.vmem [resolvable:$true] %s537_s9 }
 0x3c3   : > { %s833_s12 = scalar_lea.vmem %s1085_s9, 16  ;;  %s913_s22 = smov [#allocation5]  }
 0x3c4   : > { %p834_p2 = scmp.ne.s32.totalorder %s1085_s9, %s833_s12  ;;  %s837_s26 = sshll.u32 %s913_s22, 4  ;;  %s838_s26 = int_to_ptr.vmem [resolvable:$false] %s837_s26 }
 0x3c5   : > { %s839_s6 = scalar_lea.vmem %s838_s26, 32  ;;  %p840_p7 = scmp.lt.s32.totalorder %s1085_s9, %s838_s26 }
 0x3c6   : > { %p835_p3 = pnand %p834_p2, %p1142_p9  ;;  %p841_p8 = scmp.lt.s32.totalorder %s839_s6, %s833_s12 }
 0x3c8   : > { %p836_p4 = pneg %p835_p3  ;;  %p842_p11 = por %p841_p8, %p840_p7 }
 0x3ca   : > { %p843_p13 = pnand %p842_p11, %p836_p4 }
 0x486   : > { %v513_v35 = vpop.f32.mrb[2].mxu1 }
 0x487   : > { %518 = vst.msk [vmem:[%s246_s25] sm:$0x1] %vm517_vm4, %v513_v35  ;;  %v702_v36 = vpop.f32.mrb[3].mxu1 }
 0x488   : > { %846 = shalt.err (!%p843_p13)
}
 0x489   : > { %s847_s15 = scalar_lea.hbm %s1083_s10, 16  ;;  %s851_s13 = scalar_lea.hbm %s1130_s4, 32 }
 0x48a   : > { %p848_p1 = scmp.ne.s32.totalorder %s1083_s10, %s847_s15  ;;  %p852_p6 = scmp.lt.u32.totalorder %s1083_s10, %s1130_s4 }
 0x48b   : > { %p853_p10 = scmp.lt.u32.totalorder %s851_s13, %s847_s15  ;;  %p855_p2 = scmp.lt.u32.totalorder %s847_s15, %s1083_s10 }
 0x48c   : > { %p849_p0 = pnand %p848_p1, %p1142_p9 }
 0x48d   : > { %p854_p12 = por %p853_p10, %p852_p6 }
 0x48e   : > { %p850_p5 = pneg %p849_p0 }
 0x48f   : > { %p856_p3 = por %p855_p2, %p854_p12 }
 0x491   : > { %p857_p4 = pnand %p856_p3, %p850_p5 }
 0x493   : > { %860 = shalt.err (!%p857_p4)
}
 0x494   : > { %713 = dma.vmem_to_hbm [thread:$0]  (%p1142_p9), %s1085_s9, 16, %s1083_s10, %s521_s11  }
 0x495 PF: > { %p730_p7 = scmp.ge.s32.totalorder %s903_s21, 2  ;;  %s562_s23 = sand.u32 1, %s891_s18  }
 0x496   : > { %p1143_p8 = scmp.ne.s32.totalorder %s1136_s29, 0  ;;  %s563_s25 = scalar_lea.sflag [#allocation4], %s562_s23 }
 0x498   : > { %p722_p11 = pnand %p730_p7, %p1143_p8 }
 0x49a   : > { %882 = dma.done.wait (!%p722_p11), %s563_s25, 16  }
 0x49b   : > { %884 = vsyncadd (!%p722_p11), %s563_s25, 4294967280  ;;  %s571_s7 = scalar_lea.sflag [#allocation7], %s562_s23 }
 0x49c   : > { %886 = dma.done.wait (!%p722_p11), %s571_s7, 16  }
 0x49d   : > { %888 = vsyncadd (!%p722_p11), %s571_s7, 4294967280  ;;  %p20_p9 = scmp.ge.s32.totalorder %s969_s24, 4   ;;  %s1144_s18 = smov %s895_s19 }
 0x49e   : > { %s1145_s19 = smov %s899_s20  ;;  %s1146_s20 = smov %s980_s27 }
 0x49f   : > { %s1147_s21 = smov %s969_s24  ;;  %22 = sbr.rel (!%p20_p9) target bundleno = 6 (0x6), region = 96 }
 0x4a6   :  { %575 = vsyncpa [#allocation3], 1 }
 0x4a7   :  { %577 = vsyncpa [#allocation3 + $0x1], 1 }
 0x4a8   :  { %578 = vsyncpa [#allocation4], 1 }
 0x4a9   :  { %580 = vsyncpa [#allocation4 + $0x1], 1 }
 0x4aa   :  { %581 = vsyncpa [#allocation7], 1 }
 0x4ab   :  { %583 = vsyncpa [#allocation7 + $0x1], 1 }

</bundles_post_ra>
